<compile_context>
chip_gen: v5e
topology: v5e:2x2
jax: 0.10.0
libtpu: 0.0.40
codegen_flags: <defaults>
</compile_context>

<pallas_src>
import jax
import jax.numpy as jnp
from jax.experimental import pallas as pl
from jax.experimental.pallas import tpu as pltpu


# ----------------------------------------------------------------------------
# Pallas kernels
# ----------------------------------------------------------------------------
def _round_up(x, m):
    return ((x + m - 1) // m) * m


def _mish_f32(y):
    # mish(y) = y * tanh(softplus(y)) = y * n / (n + 2),  n = e*(e+2), e = exp(y)
    # Clamp: for y > 20, n/(n+2) == 1 to f32 precision anyway (avoids overflow).
    e = jnp.exp(jnp.minimum(y, 20.0))
    n = e * (e + 2.0)
    return y * n * pl.reciprocal(n + 2.0, approx=True)


def _make_kernel(with_residual):
    """Fused (a @ w) + bias -> Mish -> (+residual), K-accumulated in VMEM."""

    def kernel(a_ref, w_ref, b_ref, *rest):
        if with_residual:
            r_ref, o_ref, acc_ref = rest
        else:
            o_ref, acc_ref = rest
        k = pl.program_id(2)

        @pl.when(k == 0)
        def _init():
            acc_ref[...] = jnp.zeros_like(acc_ref)

        acc_ref[...] += jnp.dot(a_ref[...], w_ref[...],
                                preferred_element_type=jnp.float32)

        @pl.when(k == pl.num_programs(2) - 1)
        def _finalize():
            y = acc_ref[...] + b_ref[...]          # BN scale already folded into w
            out = _mish_f32(y)
            if with_residual:
                out = out + r_ref[...]
            o_ref[...] = out.astype(o_ref.dtype)

    return kernel


def _fused_conv_matmul(a, w_scaled, bias, residual=None):
    """Tiled fused matmul. a: [M, K] f32, w_scaled: [K, N] f32, bias: [N] f32."""
    M, K = a.shape
    N = w_scaled.shape[1]

    # Lane-dense tiles; double-buffered working set stays well under the
    # 48 MiB scoped-VMEM budget that is safe on v7x (64 MiB physical).
    tm = min(512, _round_up(M, 8))
    tn = min(256, _round_up(N, 128))
    tk = min(512, _round_up(K, 128))
    Mp, Kp, Np = _round_up(M, tm), _round_up(K, tk), _round_up(N, tn)

    a_p = jnp.pad(a.astype(jnp.bfloat16), ((0, Mp - M), (0, Kp - K)))
    w_p = jnp.pad(w_scaled.astype(jnp.bfloat16), ((0, Kp - K), (0, Np - N)))
    b_p = jnp.pad(bias.astype(jnp.float32).reshape(1, N), ((0, 0), (0, Np - N)))

    grid = (Mp // tm, Np // tn, Kp // tk)
    in_specs = [
        pl.BlockSpec((tm, tk), lambda i, j, k: (i, k)),
        pl.BlockSpec((tk, tn), lambda i, j, k: (k, j)),
        pl.BlockSpec((1, tn), lambda i, j, k: (0, j)),
    ]
    args = [a_p, w_p, b_p]
    if residual is not None:
        r_p = jnp.pad(residual.astype(jnp.float32), ((0, Mp - M), (0, Np - N)))
        in_specs.append(pl.BlockSpec((tm, tn), lambda i, j, k: (i, j)))
        args.append(r_p)

    bytes_accessed = (a_p.size * 2 + w_p.size * 2 + b_p.size * 4 + Mp * Np * 4
                      + (Mp * Np * 4 if residual is not None else 0))

    out = pl.pallas_call(
        _make_kernel(residual is not None),
        out_shape=jax.ShapeDtypeStruct((Mp, Np), jnp.float32),
        grid_spec=pltpu.PrefetchScalarGridSpec(
            num_scalar_prefetch=0,
            grid=grid,
            in_specs=in_specs,
            out_specs=pl.BlockSpec((tm, tn), lambda i, j, k: (i, j)),
            scratch_shapes=[pltpu.VMEM((tm, tn), jnp.float32)],
        ),
        compiler_params=pltpu.CompilerParams(
            dimension_semantics=("parallel", "parallel", "arbitrary"),
            vmem_limit_bytes=48 * 1024 * 1024,
        ),
        cost_estimate=pl.CostEstimate(
            flops=2 * Mp * Kp * Np,
            transcendentals=Mp * Np,
            bytes_accessed=bytes_accessed,
        ),
    )(*args)
    return out[:M, :N]


# ----------------------------------------------------------------------------
# Glue: im2col + BN folding (pure JAX, data rearrangement only)
# ----------------------------------------------------------------------------
def _im2col(x_nhwc, ksize, stride):
    n, h, w, c = x_nhwc.shape
    pad = ksize // 2
    hout = (h + 2 * pad - ksize) // stride + 1
    wout = (w + 2 * pad - ksize) // stride + 1
    xp = jnp.pad(x_nhwc, ((0, 0), (pad, pad), (pad, pad), (0, 0)))
    cols = []
    for i in range(ksize):
        for j in range(ksize):
            cols.append(xp[:, i:i + stride * hout:stride, j:j + stride * wout:stride, :])
    patches = jnp.concatenate(cols, axis=-1)            # [N, Hout, Wout, k*k*C]
    return patches.reshape(n * hout * wout, ksize * ksize * c), (n, hout, wout)


def conv_bn_mish(x_nhwc, params, stride=1, residual_nhwc=None):
    """Convolutional(filters_in, filters_out, k, stride) with folded BN + Mish."""
    w = params["w"]                                      # [Cout, Cin, kh, kw] (OIHW)
    cout, cin, kh, kw = w.shape
    if kh == 1 and stride == 1:
        n, h, wsp, _ = x_nhwc.shape
        patches = x_nhwc.reshape(n * h * wsp, cin)       # 1x1 conv: pure reshape
        hout, wout = h, wsp
    else:
        patches, (n, hout, wout) = _im2col(x_nhwc, kh, stride)
    # taps (i, j) outer, Cin inner -> [kh*kw*Cin, Cout]
    w2d = jnp.transpose(w, (2, 3, 1, 0)).reshape(kh * kw * cin, cout)
    eps = 1e-5
    inv_std = params["gamma"] * jax.lax.rsqrt(params["var"] + eps)
    w2d = w2d * inv_std[None, :]                         # fold BN scale into weights
    bias = params["beta"] - params["mean"] * inv_std
    res = None if residual_nhwc is None else residual_nhwc.reshape(-1, cout)
    out = _fused_conv_matmul(patches, w2d, bias, res)
    return out.reshape(n, hout, wout, cout)


# ----------------------------------------------------------------------------
# Deterministic parameter construction (synthetic, matches nn.Module shapes)
# ----------------------------------------------------------------------------
def make_conv_params(key, cin, cout, ksize):
    k1, k2, k3, k4, k5 = jax.random.split(key, 5)
    return dict(
        w=0.1 * jax.random.normal(k1, (cout, cin, ksize, ksize), jnp.float32),
        gamma=1.0 + 0.1 * jax.random.normal(k2, (cout,), jnp.float32),
        beta=0.1 * jax.random.normal(k3, (cout,), jnp.float32),
        mean=0.1 * jax.random.normal(k4, (cout,), jnp.float32),
        var=1.0 + 0.1 * jnp.abs(jax.random.normal(k5, (cout,), jnp.float32)),
    )


def make_csp_first_stage_params(key, in_channels, out_channels):
    keys = jax.random.split(key, 7)
    return dict(
        downsample=make_conv_params(keys[0], in_channels, out_channels, 3),
        split0=make_conv_params(keys[1], out_channels, out_channels, 1),
        split1=make_conv_params(keys[2], out_channels, out_channels, 1),
        # CSPBlock(out, out, hidden=in_channels): 1x1 (out->in), 3x3 (in->out)
        csp_conv1=make_conv_params(keys[3], out_channels, in_channels, 1),
        csp_conv2=make_conv_params(keys[4], in_channels, out_channels, 3),
        blocks_out=make_conv_params(keys[5], out_channels, out_channels, 1),
        concat=make_conv_params(keys[6], 2 * out_channels, out_channels, 1),
    )


# ----------------------------------------------------------------------------
# CSPFirstStage forward
# ----------------------------------------------------------------------------
def csp_first_stage(x_nchw, params):
    x = jnp.transpose(x_nchw, (0, 2, 3, 1))                       # NCHW -> NHWC
    x = conv_bn_mish(x, params["downsample"], stride=2)           # downsample_conv
    x0 = conv_bn_mish(x, params["split0"])                        # split_conv0
    x1 = conv_bn_mish(x, params["split1"])                        # split_conv1
    # CSPBlock: 1x1 -> 3x3, then residual add (linear residual activation)
    res = x1
    h = conv_bn_mish(x1, params["csp_conv1"])
    h = conv_bn_mish(h, params["csp_conv2"], residual_nhwc=res)
    x1 = conv_bn_mish(h, params["blocks_out"])                    # trailing 1x1
    x = jnp.concatenate([x1, x0], axis=-1)                        # cat([x1, x0], dim=C)
    x = conv_bn_mish(x, params["concat"])                         # concat_conv
    return jnp.transpose(x, (0, 3, 1, 2))                         # NHWC -> NCHW


# ----------------------------------------------------------------------------
# Pure-JAX reference (sanity check for the Pallas path)
# ----------------------------------------------------------------------------
def _ref_conv_bn_mish(x_nhwc, p, stride=1, residual=None):
    w = p["w"]
    kh = w.shape[2]
    y = jax.lax.conv_general_dilated(
        x_nhwc, jnp.transpose(w, (2, 3, 1, 0)),
        window_strides=(stride, stride),
        padding=[(kh // 2, kh // 2)] * 2,
        dimension_numbers=("NHWC", "HWIO", "NHWC"))
    eps = 1e-5
    inv_std = p["gamma"] / jnp.sqrt(p["var"] + eps)
    y = y * inv_std + (p["beta"] - p["mean"] * inv_std)
    y = y * jnp.tanh(jax.nn.softplus(y))
    if residual is not None:
        y = y + residual
    return y


def _ref_csp_first_stage(x_nchw, params):
    x = jnp.transpose(x_nchw, (0, 2, 3, 1))
    x = _ref_conv_bn_mish(x, params["downsample"], stride=2)
    x0 = _ref_conv_bn_mish(x, params["split0"])
    x1 = _ref_conv_bn_mish(x, params["split1"])
    res = x1
    h = _ref_conv_bn_mish(x1, params["csp_conv1"])
    h = _ref_conv_bn_mish(h, params["csp_conv2"], residual=res)
    x1 = _ref_conv_bn_mish(h, params["blocks_out"])
    x = jnp.concatenate([x1, x0], axis=-1)
    x = _ref_conv_bn_mish(x, params["concat"])
    return jnp.transpose(x, (0, 3, 1, 2))


if __name__ == "__main__":
    key = jax.random.PRNGKey(0)
    k_x, k_p = jax.random.split(key)

    in_channels, out_channels = 4, 8
    x = jax.random.normal(k_x, (2, in_channels, 16, 16), jnp.float32)   # NCHW
    params = make_csp_first_stage_params(k_p, in_channels, out_channels)

    out = jax.jit(csp_first_stage)(x, params)
    out = jax.block_until_ready(out)
    assert out.shape == (2, out_channels, 8, 8), out.shape

    ref = jax.block_until_ready(_ref_csp_first_stage(x, params))
    # bf16 MXU operands + approx-reciprocal Mish: tolerance loosened slightly.
    assert jnp.allclose(out, ref, rtol=2e-2, atol=2e-2), float(jnp.max(jnp.abs(out - ref)))

    print("KERNEL_OK")
</pallas_src>

<mosaic_0001>
module attributes {stable_mosaic.version = 11 : i64} {
  func.func @kernel(%arg0: i32, %arg1: i32, %arg2: i32, %arg3: memref<128x128xbf16, #tpu.memory_space<vmem>>, %arg4: memref<128x128xbf16, #tpu.memory_space<vmem>>, %arg5: memref<1x128xf32, #tpu.memory_space<vmem>>, %arg6: memref<128x128xf32, #tpu.memory_space<vmem>>, %arg7: memref<128x128xf32, #tpu.memory_space<vmem>>) attributes {dimension_semantics = [#tpu.dimension_semantics<parallel>, #tpu.dimension_semantics<parallel>, #tpu.dimension_semantics<arbitrary>], iteration_bounds = array<i64: 1, 1, 1>, scalar_prefetch = 0 : i64, scratch_operands = 1 : i64, tpu.core_type = #tpu.core_type<tc>, window_params = [{transform_indices = @transform_0, window_bounds = array<i64: 128, 128>}, {transform_indices = @transform_1, window_bounds = array<i64: 128, 128>}, {transform_indices = @transform_2, window_bounds = array<i64: 1, 128>}, {transform_indices = @transform_3, window_bounds = array<i64: 128, 128>}]} {
    %c0_i32 = arith.constant 0 : i32
    %0 = arith.cmpi eq, %arg2, %c0_i32 : i32
    %1 = arith.extui %0 : i1 to i32
    %c0_i32_0 = arith.constant 0 : i32
    %2 = arith.cmpi ne, %1, %c0_i32_0 : i32
    scf.if %2 {
      %cst_10 = arith.constant 0.000000e+00 : f32
      %12 = vector.broadcast %cst_10 : f32 to vector<128x128xf32>
      %c0_11 = arith.constant 0 : index
      %c0_12 = arith.constant 0 : index
      %13 = vector.load %arg7[%c0_11, %c0_12] : memref<128x128xf32, #tpu.memory_space<vmem>>, vector<128x128xf32>
      tpu.vector_store %arg7[%c0_11, %c0_12], %12 {strides = array<i32>} : memref<128x128xf32, #tpu.memory_space<vmem>>, vector<128x128xf32>,
    } else {
    }
    %c0 = arith.constant 0 : index
    %c0_1 = arith.constant 0 : index
    %3 = vector.load %arg7[%c0, %c0_1] : memref<128x128xf32, #tpu.memory_space<vmem>>, vector<128x128xf32>
    %c0_2 = arith.constant 0 : index
    %c0_3 = arith.constant 0 : index
    %4 = vector.load %arg3[%c0_2, %c0_3] : memref<128x128xbf16, #tpu.memory_space<vmem>>, vector<128x128xbf16>
    %c0_4 = arith.constant 0 : index
    %c0_5 = arith.constant 0 : index
    %5 = vector.load %arg4[%c0_4, %c0_5] : memref<128x128xbf16, #tpu.memory_space<vmem>>, vector<128x128xbf16>
    %cst = arith.constant dense<0.000000e+00> : vector<128x128xf32>
    %6 = tpu.matmul %4, %5, %cst {dimension_numbers = #tpu.dot_dimension_numbers<[1], [0], [0], [1], [0, 0, 1, 1], [], []>} : vector<128x128xbf16>, vector<128x128xbf16>, vector<128x128xf32> -> vector<128x128xf32>
    %7 = arith.addf %3, %6 : vector<128x128xf32>
    %c0_6 = arith.constant 0 : index
    %c0_7 = arith.constant 0 : index
    %8 = vector.load %arg7[%c0_6, %c0_7] : memref<128x128xf32, #tpu.memory_space<vmem>>, vector<128x128xf32>
    tpu.vector_store %arg7[%c0_6, %c0_7], %7 {strides = array<i32>} : memref<128x128xf32, #tpu.memory_space<vmem>>, vector<128x128xf32>,
    %c0_i32_8 = arith.constant 0 : i32
    %9 = arith.cmpi eq, %arg2, %c0_i32_8 : i32
    %10 = arith.extui %9 : i1 to i32
    %c0_i32_9 = arith.constant 0 : i32
    %11 = arith.cmpi ne, %10, %c0_i32_9 : i32
    scf.if %11 {
      %c0_10 = arith.constant 0 : index
      %c0_11 = arith.constant 0 : index
      %12 = vector.load %arg7[%c0_10, %c0_11] : memref<128x128xf32, #tpu.memory_space<vmem>>, vector<128x128xf32>
      %c0_12 = arith.constant 0 : index
      %c0_13 = arith.constant 0 : index
      %13 = vector.load %arg5[%c0_12, %c0_13] : memref<1x128xf32, #tpu.memory_space<vmem>>, vector<1x128xf32>
      %14 = vector.broadcast %13 : vector<1x128xf32> to vector<128x128xf32>
      %15 = arith.addf %12, %14 : vector<128x128xf32>
      %cst_14 = arith.constant 2.000000e+01 : f32
      %16 = vector.broadcast %cst_14 : f32 to vector<128x128xf32>
      %17 = arith.minimumf %15, %16 : vector<128x128xf32>
      %18 = math.exp %17 : vector<128x128xf32>
      %cst_15 = arith.constant 2.000000e+00 : f32
      %19 = vector.broadcast %cst_15 : f32 to vector<128x128xf32>
      %20 = arith.addf %18, %19 : vector<128x128xf32>
      %21 = arith.mulf %18, %20 : vector<128x128xf32>
      %22 = arith.mulf %15, %21 : vector<128x128xf32>
      %cst_16 = arith.constant 2.000000e+00 : f32
      %23 = vector.broadcast %cst_16 : f32 to vector<128x128xf32>
      %24 = arith.addf %21, %23 : vector<128x128xf32>
      %25 = tpu.reciprocal %24 {approx = true} : vector<128x128xf32> -> vector<128x128xf32>
      %26 = arith.mulf %22, %25 : vector<128x128xf32>
      %c0_17 = arith.constant 0 : index
      %c0_18 = arith.constant 0 : index
      %27 = vector.load %arg6[%c0_17, %c0_18] : memref<128x128xf32, #tpu.memory_space<vmem>>, vector<128x128xf32>
      tpu.vector_store %arg6[%c0_17, %c0_18], %26 {strides = array<i32>} : memref<128x128xf32, #tpu.memory_space<vmem>>, vector<128x128xf32>,
    } else {
    }
    return
  }
  func.func @transform_0(%arg0: i32, %arg1: i32, %arg2: i32) -> (i32, i32) {
    %c0_i32 = arith.constant 0 : i32
    return %arg0, %arg2 : i32, i32
  }
  func.func @transform_1(%arg0: i32, %arg1: i32, %arg2: i32) -> (i32, i32) {
    %c0_i32 = arith.constant 0 : i32
    return %arg2, %arg1 : i32, i32
  }
  func.func @transform_2(%arg0: i32, %arg1: i32, %arg2: i32) -> (i32, i32) {
    %c0_i32 = arith.constant 0 : i32
    %c0_i32_0 = arith.constant 0 : i32
    return %c0_i32, %arg1 : i32, i32
  }
  func.func @transform_3(%arg0: i32, %arg1: i32, %arg2: i32) -> (i32, i32) {
    %c0_i32 = arith.constant 0 : i32
    return %arg0, %arg1 : i32, i32
  }
}

module attributes {stable_mosaic.version = 11 : i64} {
  func.func @kernel(%arg0: i32, %arg1: i32, %arg2: i32, %arg3: memref<128x128xbf16, #tpu.memory_space<vmem>>, %arg4: memref<128x128xbf16, #tpu.memory_space<vmem>>, %arg5: memref<1x128xf32, #tpu.memory_space<vmem>>, %arg6: memref<128x128xf32, #tpu.memory_space<vmem>>, %arg7: memref<128x128xf32, #tpu.memory_space<vmem>>, %arg8: memref<128x128xf32, #tpu.memory_space<vmem>>) attributes {dimension_semantics = [#tpu.dimension_semantics<parallel>, #tpu.dimension_semantics<parallel>, #tpu.dimension_semantics<arbitrary>], iteration_bounds = array<i64: 1, 1, 1>, scalar_prefetch = 0 : i64, scratch_operands = 1 : i64, tpu.core_type = #tpu.core_type<tc>, window_params = [{transform_indices = @transform_0, window_bounds = array<i64: 128, 128>}, {transform_indices = @transform_1, window_bounds = array<i64: 128, 128>}, {transform_indices = @transform_2, window_bounds = array<i64: 1, 128>}, {transform_indices = @transform_3, window_bounds = array<i64: 128, 128>}, {transform_indices = @transform_4, window_bounds = array<i64: 128, 128>}]} {
    %c0_i32 = arith.constant 0 : i32
    %0 = arith.cmpi eq, %arg2, %c0_i32 : i32
    %1 = arith.extui %0 : i1 to i32
    %c0_i32_0 = arith.constant 0 : i32
    %2 = arith.cmpi ne, %1, %c0_i32_0 : i32
    scf.if %2 {
      %cst_10 = arith.constant 0.000000e+00 : f32
      %12 = vector.broadcast %cst_10 : f32 to vector<128x128xf32>
      %c0_11 = arith.constant 0 : index
      %c0_12 = arith.constant 0 : index
      %13 = vector.load %arg8[%c0_11, %c0_12] : memref<128x128xf32, #tpu.memory_space<vmem>>, vector<128x128xf32>
      tpu.vector_store %arg8[%c0_11, %c0_12], %12 {strides = array<i32>} : memref<128x128xf32, #tpu.memory_space<vmem>>, vector<128x128xf32>,
    } else {
    }
    %c0 = arith.constant 0 : index
    %c0_1 = arith.constant 0 : index
    %3 = vector.load %arg8[%c0, %c0_1] : memref<128x128xf32, #tpu.memory_space<vmem>>, vector<128x128xf32>
    %c0_2 = arith.constant 0 : index
    %c0_3 = arith.constant 0 : index
    %4 = vector.load %arg3[%c0_2, %c0_3] : memref<128x128xbf16, #tpu.memory_space<vmem>>, vector<128x128xbf16>
    %c0_4 = arith.constant 0 : index
    %c0_5 = arith.constant 0 : index
    %5 = vector.load %arg4[%c0_4, %c0_5] : memref<128x128xbf16, #tpu.memory_space<vmem>>, vector<128x128xbf16>
    %cst = arith.constant dense<0.000000e+00> : vector<128x128xf32>
    %6 = tpu.matmul %4, %5, %cst {dimension_numbers = #tpu.dot_dimension_numbers<[1], [0], [0], [1], [0, 0, 1, 1], [], []>} : vector<128x128xbf16>, vector<128x128xbf16>, vector<128x128xf32> -> vector<128x128xf32>
    %7 = arith.addf %3, %6 : vector<128x128xf32>
    %c0_6 = arith.constant 0 : index
    %c0_7 = arith.constant 0 : index
    %8 = vector.load %arg8[%c0_6, %c0_7] : memref<128x128xf32, #tpu.memory_space<vmem>>, vector<128x128xf32>
    tpu.vector_store %arg8[%c0_6, %c0_7], %7 {strides = array<i32>} : memref<128x128xf32, #tpu.memory_space<vmem>>, vector<128x128xf32>,
    %c0_i32_8 = arith.constant 0 : i32
    %9 = arith.cmpi eq, %arg2, %c0_i32_8 : i32
    %10 = arith.extui %9 : i1 to i32
    %c0_i32_9 = arith.constant 0 : i32
    %11 = arith.cmpi ne, %10, %c0_i32_9 : i32
    scf.if %11 {
      %c0_10 = arith.constant 0 : index
      %c0_11 = arith.constant 0 : index
      %12 = vector.load %arg8[%c0_10, %c0_11] : memref<128x128xf32, #tpu.memory_space<vmem>>, vector<128x128xf32>
      %c0_12 = arith.constant 0 : index
      %c0_13 = arith.constant 0 : index
      %13 = vector.load %arg5[%c0_12, %c0_13] : memref<1x128xf32, #tpu.memory_space<vmem>>, vector<1x128xf32>
      %14 = vector.broadcast %13 : vector<1x128xf32> to vector<128x128xf32>
      %15 = arith.addf %12, %14 : vector<128x128xf32>
      %cst_14 = arith.constant 2.000000e+01 : f32
      %16 = vector.broadcast %cst_14 : f32 to vector<128x128xf32>
      %17 = arith.minimumf %15, %16 : vector<128x128xf32>
      %18 = math.exp %17 : vector<128x128xf32>
      %cst_15 = arith.constant 2.000000e+00 : f32
      %19 = vector.broadcast %cst_15 : f32 to vector<128x128xf32>
      %20 = arith.addf %18, %19 : vector<128x128xf32>
      %21 = arith.mulf %18, %20 : vector<128x128xf32>
      %22 = arith.mulf %15, %21 : vector<128x128xf32>
      %cst_16 = arith.constant 2.000000e+00 : f32
      %23 = vector.broadcast %cst_16 : f32 to vector<128x128xf32>
      %24 = arith.addf %21, %23 : vector<128x128xf32>
      %25 = tpu.reciprocal %24 {approx = true} : vector<128x128xf32> -> vector<128x128xf32>
      %26 = arith.mulf %22, %25 : vector<128x128xf32>
      %c0_17 = arith.constant 0 : index
      %c0_18 = arith.constant 0 : index
      %27 = vector.load %arg6[%c0_17, %c0_18] : memref<128x128xf32, #tpu.memory_space<vmem>>, vector<128x128xf32>
      %28 = arith.addf %26, %27 : vector<128x128xf32>
      %c0_19 = arith.constant 0 : index
      %c0_20 = arith.constant 0 : index
      %29 = vector.load %arg7[%c0_19, %c0_20] : memref<128x128xf32, #tpu.memory_space<vmem>>, vector<128x128xf32>
      tpu.vector_store %arg7[%c0_19, %c0_20], %28 {strides = array<i32>} : memref<128x128xf32, #tpu.memory_space<vmem>>, vector<128x128xf32>,
    } else {
    }
    return
  }
  func.func @transform_0(%arg0: i32, %arg1: i32, %arg2: i32) -> (i32, i32) {
    %c0_i32 = arith.constant 0 : i32
    return %arg0, %arg2 : i32, i32
  }
  func.func @transform_1(%arg0: i32, %arg1: i32, %arg2: i32) -> (i32, i32) {
    %c0_i32 = arith.constant 0 : i32
    return %arg2, %arg1 : i32, i32
  }
  func.func @transform_2(%arg0: i32, %arg1: i32, %arg2: i32) -> (i32, i32) {
    %c0_i32 = arith.constant 0 : i32
    %c0_i32_0 = arith.constant 0 : i32
    return %c0_i32, %arg1 : i32, i32
  }
  func.func @transform_3(%arg0: i32, %arg1: i32, %arg2: i32) -> (i32, i32) {
    %c0_i32 = arith.constant 0 : i32
    return %arg0, %arg1 : i32, i32
  }
  func.func @transform_4(%arg0: i32, %arg1: i32, %arg2: i32) -> (i32, i32) {
    %c0_i32 = arith.constant 0 : i32
    return %arg0, %arg1 : i32, i32
  }
}

</mosaic_0001>

<bundles_post_ra>
// kernel: csp_first_stage.7
= control target key start
LH: loop header
LB: loop body
LE: loop exit
PB: predicated region body
PF: predicated region fallthrough
CT: control target
= control target key end

     0   :  { %s832_s1 = inlined_call_operand.vmem [shape: bf16[128,128], index: 1, kind: input, shape index: {}]   ;;  %s833_s2 = inlined_call_operand.vmem [shape: f32[1,128], index: 2, kind: input, shape index: {}]   ;;  %s834_s0 = inlined_call_operand.vmem [shape: bf16[128,128], index: 0, kind: input, shape index: {}]   ;;  %s835_s3 = inlined_call_operand.vmem [shape: f32[128,128], index: 3, kind: output, shape index: {}]  }
   0x1   :  { %v541_v0 = vld [vmem:[%s832_s1 + $0x38] sm:$0xff]  ;;  %v540_v1 = vld [vmem:[%s832_s1 + $0x30] sm:$0xff]  ;;  %v539_v2 = vld [vmem:[%s832_s1 + $0x28] sm:$0xff] }
   0x2   :  { %178 = vmatpush.bf16.msra.mxu0 %v541_v0  ;;  %542 = vmatpush.bf16.msra.mxu1 %v541_v0  ;;  %v538_v3 = vld [vmem:[%s832_s1 + $0x20] sm:$0xff]  ;;  %v537_v4 = vld [vmem:[%s832_s1 + $0x18] sm:$0xff]  ;;  %v536_v5 = vld [vmem:[%s832_s1 + $0x10] sm:$0xff] }
   0x3   :  { %543 = vmatpush.bf16.msra.mxu2 %v541_v0  ;;  %544 = vmatpush.bf16.msra.mxu3 %v541_v0  ;;  %v535_v6 = vld [vmem:[%s832_s1 + $0x8] sm:$0xff]  ;;  %v534_v7 = vld [vmem:[%s832_s1] sm:$0xff]  ;;  %v528_v9 = vld [vmem:[%s834_s0 + $0x10] sm:$0xff] }
   0x4   :  { %v526_v8 = vld [vmem:[%s834_s0] sm:$0xff]  ;;  %v532_v11 = vld [vmem:[%s834_s0 + $0x30] sm:$0xff]  ;;  %v527_v12 = vld [vmem:[%s834_s0 + $0x8] sm:$0xff] }
   0x5   :  { %v530_v10 = vld [vmem:[%s834_s0 + $0x20] sm:$0xff]  ;;  %v529_v13 = vld [vmem:[%s834_s0 + $0x18] sm:$0xff]  ;;  %v531_v14 = vld [vmem:[%s834_s0 + $0x28] sm:$0xff] }
   0x6   :  { %179 = vmatpush.bf16.msra.mxu0 %v540_v1  ;;  %545 = vmatpush.bf16.msra.mxu1 %v540_v1  ;;  %v533_v15 = vld [vmem:[%s834_s0 + $0x38] sm:$0xff]  ;;  %v702_v16 = vld [vmem:[%s833_s2] ss:$0 sm:$0xff] }
   0x7   :  { %546 = vmatpush.bf16.msra.mxu2 %v540_v1  ;;  %547 = vmatpush.bf16.msra.mxu3 %v540_v1 }
   0xa   :  { %180 = vmatpush.bf16.msra.mxu0 %v539_v2  ;;  %548 = vmatpush.bf16.msra.mxu1 %v539_v2 }
   0xb   :  { %549 = vmatpush.bf16.msra.mxu2 %v539_v2  ;;  %550 = vmatpush.bf16.msra.mxu3 %v539_v2 }
   0xe   :  { %181 = vmatpush.bf16.msra.mxu0 %v538_v3  ;;  %551 = vmatpush.bf16.msra.mxu1 %v538_v3 }
   0xf   :  { %552 = vmatpush.bf16.msra.mxu2 %v538_v3  ;;  %553 = vmatpush.bf16.msra.mxu3 %v538_v3 }
  0x12   :  { %182 = vmatpush.bf16.msra.mxu0 %v537_v4  ;;  %554 = vmatpush.bf16.msra.mxu1 %v537_v4 }
  0x13   :  { %555 = vmatpush.bf16.msra.mxu2 %v537_v4  ;;  %556 = vmatpush.bf16.msra.mxu3 %v537_v4 }
  0x16   :  { %183 = vmatpush.bf16.msra.mxu0 %v536_v5  ;;  %557 = vmatpush.bf16.msra.mxu1 %v536_v5 }
  0x17   :  { %558 = vmatpush.bf16.msra.mxu2 %v536_v5  ;;  %559 = vmatpush.bf16.msra.mxu3 %v536_v5 }
  0x1a   :  { %184 = vmatpush.bf16.msra.mxu0 %v535_v6  ;;  %560 = vmatpush.bf16.msra.mxu1 %v535_v6 }
  0x1b   :  { %561 = vmatpush.bf16.msra.mxu2 %v535_v6  ;;  %562 = vmatpush.bf16.msra.mxu3 %v535_v6 }
  0x1e   :  { %185 = vmatpush.bf16.msra.mxu0 %v534_v7  ;;  %563 = vmatpush.bf16.msra.mxu1 %v534_v7 }
  0x1f   :  { %564 = vmatpush.bf16.msra.mxu2 %v534_v7  ;;  %565 = vmatpush.bf16.msra.mxu3 %v534_v7 }
  0x21   :  { %186 = vmatmul.bf16.vlgmr.msra.gmra.mxu0 %v526_v8  ;;  %196 = vmatmul.bf16.vlgmr.msra.gmra.mxu1 %v528_v9 }
  0x22   :  { %206 = vmatmul.bf16.vlgmr.msra.gmra.mxu2 %v530_v10  ;;  %216 = vmatmul.bf16.vlgmr.msra.gmra.mxu3 %v532_v11 }
  0x31   :  { %191 = vmatmul.bf16.gmra.mxu0 %v527_v12  ;;  %201 = vmatmul.bf16.gmra.mxu1 %v529_v13 }
  0x32   :  { %211 = vmatmul.bf16.gmra.mxu2 %v531_v14  ;;  %221 = vmatmul.bf16.gmra.mxu3 %v533_v15 }
  0x9e   :  { %v187_v17 = vpop.f32.mrf.mxu0  ;;  %v197_v18 = vpop.f32.mrf.mxu1 }
  0x9f   :  { %v705_v19 = vadd.f32 %v702_v16, %v187_v17  ;;  %v708_v20 = vadd.f32 %v702_v16, %v197_v18 }
  0xa1   :  { %v298_v21 = vmin.f32 %v705_v19, 20.0  ;;  %v302_v22 = vmin.f32 %v708_v20, 20.0 }
  0xa3   :  { %v314_v23 = vmul.f32 1.442695, %v298_v21  ;;  %v322_v24 = vmul.f32 1.442695, %v302_v22 }
  0xa5   :  { %567 = vpow2.f32 %v314_v23  ;;  %v207_v25 = vpop.f32.mrf.mxu2  ;;  %v217_v26 = vpop.f32.mrf.mxu3 }
  0xa6   :  { %569 = vpow2.f32 %v322_v24  ;;  %v713_v27 = vadd.f32 %v702_v16, %v207_v25  ;;  %v716_v28 = vadd.f32 %v702_v16, %v217_v26  ;;  %v189_v29 = vpop.f32.mrf.mxu0  ;;  %v199_v30 = vpop.f32.mrf.mxu1 }
  0xa7   :  { %v719_v31 = vadd.f32 %v702_v16, %v189_v29  ;;  %v722_v32 = vadd.f32 %v702_v16, %v199_v30 }
  0xa8   :  { %v306_v33 = vmin.f32 %v713_v27, 20.0  ;;  %v310_v34 = vmin.f32 %v716_v28, 20.0 }
  0xa9   :  { %v299_v35 = vmin.f32 %v719_v31, 20.0  ;;  %v303_v36 = vmin.f32 %v722_v32, 20.0 }
  0xaa   :  { %v330_v37 = vmul.f32 1.442695, %v306_v33  ;;  %v338_v38 = vmul.f32 1.442695, %v310_v34 }
  0xab   :  { %v568_v39 = vpop.eup %567  ;;  %v316_v40 = vmul.f32 1.442695, %v299_v35  ;;  %v324_v41 = vmul.f32 1.442695, %v303_v36 }
  0xac   :  { %v570_v42 = vpop.eup %569  ;;  %v346_v43 = vadd.f32 2.0, %v568_v39  ;;  %571 = vpow2.f32 %v330_v37 }
  0xad   :  { %v350_v44 = vadd.f32 2.0, %v570_v42  ;;  %573 = vpow2.f32 %v338_v38  ;;  %v209_v45 = vpop.f32.mrf.mxu2  ;;  %v219_v46 = vpop.f32.mrf.mxu3 }
  0xae   :  { %v362_v47 = vmul.f32 %v568_v39, %v346_v43  ;;  %575 = vpow2.f32 %v316_v40  ;;  %v729_v48 = vadd.f32 %v702_v16, %v209_v45  ;;  %v732_v49 = vadd.f32 %v702_v16, %v219_v46  ;;  %v192_v50 = vpop.f32.mrf.mxu0  ;;  %v202_v51 = vpop.f32.mrf.mxu1 }
  0xaf   :  { %v366_v52 = vmul.f32 %v570_v42, %v350_v44  ;;  %577 = vpow2.f32 %v324_v41  ;;  %v735_v53 = vadd.f32 %v702_v16, %v192_v50  ;;  %v738_v54 = vadd.f32 %v702_v16, %v202_v51 }
  0xb0   :  { %v394_v55 = vadd.f32 2.0, %v362_v47  ;;  %v307_v56 = vmin.f32 %v729_v48, 20.0  ;;  %v311_v57 = vmin.f32 %v732_v49, 20.0  ;;  %v378_v13 = vmul.f32 %v362_v47, %v705_v19 }
  0xb1   :  { %v398_v58 = vadd.f32 2.0, %v366_v52  ;;  %v300_v59 = vmin.f32 %v735_v53, 20.0  ;;  %v304_v60 = vmin.f32 %v738_v54, 20.0  ;;  %v382_v21 = vmul.f32 %v366_v52, %v708_v20 }
  0xb2   :  { %v572_v61 = vpop.eup %571  ;;  %579 = vrcp.f32 %v394_v55  ;;  %v332_v62 = vmul.f32 1.442695, %v307_v56  ;;  %v340_v63 = vmul.f32 1.442695, %v311_v57 }
  0xb3   :  { %v574_v0 = vpop.eup %573  ;;  %581 = vrcp.f32 %v398_v58  ;;  %v354_v1 = vadd.f32 2.0, %v572_v61  ;;  %v318_v2 = vmul.f32 1.442695, %v300_v59  ;;  %v326_v3 = vmul.f32 1.442695, %v304_v60 }
  0xb4   :  { %v576_v4 = vpop.eup %575  ;;  %v358_v5 = vadd.f32 2.0, %v574_v0  ;;  %583 = vpow2.f32 %v332_v62 }
  0xb5   :  { %v578_v6 = vpop.eup %577  ;;  %v370_v7 = vmul.f32 %v572_v61, %v354_v1  ;;  %v347_v8 = vadd.f32 2.0, %v576_v4  ;;  %585 = vpow2.f32 %v340_v63  ;;  %v212_v9 = vpop.f32.mrf.mxu2 }
  0xb6   :  { %v374_v10 = vmul.f32 %v574_v0, %v358_v5  ;;  %v351_v11 = vadd.f32 2.0, %v578_v6  ;;  %587 = vpow2.f32 %v318_v2  ;;  %v745_v12 = vadd.f32 %v702_v16, %v212_v9  ;;  %v222_v17 = vpop.f32.mrf.mxu3  ;;  %v194_v30 = vpop.f32.mrf.mxu0 }
  0xb7   :  { %v402_v14 = vadd.f32 2.0, %v370_v7  ;;  %v363_v15 = vmul.f32 %v576_v4, %v347_v8  ;;  %589 = vpow2.f32 %v326_v3  ;;  %v204_v33 = vpop.f32.mrf.mxu1  ;;  %v386_v19 = vmul.f32 %v370_v7, %v713_v27 }
  0xb8   :  { %v580_v18 = vpop.eup %579  ;;  %v406_v22 = vadd.f32 2.0, %v374_v10  ;;  %v367_v23 = vmul.f32 %v578_v6, %v351_v11  ;;  %v308_v24 = vmin.f32 %v745_v12, 20.0  ;;  %v755_v39 = vadd.f32 %v702_v16, %v222_v17 }
  0xb9   :  { %v582_v25 = vpop.eup %581  ;;  %v426_v26 = vmul.f32 %v580_v18, %v378_v13  ;;  %591 = vrcp.f32 %v402_v14  ;;  %v395_v29 = vadd.f32 2.0, %v363_v15  ;;  %v761_v41 = vadd.f32 %v702_v16, %v194_v30 }
  0xba   :  { %v584_v34 = vpop.eup %583  ;;  %v430_v35 = vmul.f32 %v582_v25, %v382_v21  ;;  %593 = vrcp.f32 %v406_v22  ;;  %v399_v36 = vadd.f32 2.0, %v367_v23  ;;  %v334_v38 = vmul.f32 1.442695, %v308_v24 }
  0xbb   :  { %v586_v37 = vpop.eup %585  ;;  %442 = vst [vmem:[%s835_s3] sm:$0xff] %v426_v26  ;;  %595 = vrcp.f32 %v395_v29  ;;  %v355_v20 = vadd.f32 2.0, %v584_v34  ;;  %v764_v42 = vadd.f32 %v702_v16, %v204_v33  ;;  %v312_v46 = vmin.f32 %v755_v39, 20.0 }
  0xbc   :  { %v588_v40 = vpop.eup %587  ;;  %446 = vst [vmem:[%s835_s3 + $0x20] sm:$0xff] %v430_v35  ;;  %597 = vrcp.f32 %v399_v36  ;;  %v359_v27 = vadd.f32 2.0, %v586_v37  ;;  %v390_v47 = vmul.f32 %v374_v10, %v716_v28  ;;  %v379_v50 = vmul.f32 %v363_v15, %v719_v31 }
  0xbd   :  { %v590_v43 = vpop.eup %589  ;;  %v371_v44 = vmul.f32 %v584_v34, %v355_v20  ;;  %v348_v45 = vadd.f32 2.0, %v588_v40  ;;  %599 = vpow2.f32 %v334_v38  ;;  %v301_v58 = vmin.f32 %v761_v41, 20.0  ;;  %v214_v3 = vpop.f32.mrf.mxu2 }
  0xbe   :  { %v375_v51 = vmul.f32 %v586_v37, %v359_v27  ;;  %v352_v52 = vadd.f32 2.0, %v590_v43  ;;  %v305_v59 = vmin.f32 %v764_v42, 20.0  ;;  %v383_v62 = vmul.f32 %v367_v23, %v722_v32  ;;  %v224_v4 = vpop.f32.mrf.mxu3 }
  0xbf   :  { %v592_v55 = vpop.eup %591  ;;  %v403_v56 = vadd.f32 2.0, %v371_v44  ;;  %v364_v57 = vmul.f32 %v588_v40, %v348_v45  ;;  %v342_v31 = vmul.f32 1.442695, %v312_v46  ;;  %v320_v9 = vmul.f32 1.442695, %v301_v58 }
  0xc0   :  { %v594_v60 = vpop.eup %593  ;;  %v434_v61 = vmul.f32 %v592_v55, %v386_v19  ;;  %v407_v63 = vadd.f32 2.0, %v375_v51  ;;  %v368_v0 = vmul.f32 %v590_v43, %v352_v52  ;;  %v328_v10 = vmul.f32 1.442695, %v305_v59 }
  0xc1   :  { %v596_v1 = vpop.eup %595  ;;  %v438_v2 = vmul.f32 %v594_v60, %v390_v47  ;;  %601 = vrcp.f32 %v403_v56  ;;  %v396_v28 = vadd.f32 2.0, %v364_v57  ;;  %v782_v13 = vadd.f32 %v702_v16, %v214_v3 }
  0xc2   :  { %v598_v5 = vpop.eup %597  ;;  %450 = vst [vmem:[%s835_s3 + $0x40] sm:$0xff] %v434_v61  ;;  %v427_v6 = vmul.f32 %v596_v1, %v379_v50  ;;  %603 = vrcp.f32 %v407_v63  ;;  %v400_v7 = vadd.f32 2.0, %v368_v0  ;;  %v785_v14 = vadd.f32 %v702_v16, %v224_v4 }
  0xc3   :  { %v600_v8 = vpop.eup %599  ;;  %454 = vst [vmem:[%s835_s3 + $0x60] sm:$0xff] %v438_v2  ;;  %v431_v32 = vmul.f32 %v598_v5, %v383_v62  ;;  %605 = vrcp.f32 %v396_v28  ;;  %v387_v15 = vmul.f32 %v371_v44, %v729_v48  ;;  %v309_v18 = vmin.f32 %v782_v13, 20.0 }
  0xc4   :  { %443 = vst [vmem:[%s835_s3 + $0x8] sm:$0xff] %v427_v6  ;;  %607 = vrcp.f32 %v400_v7  ;;  %v356_v11 = vadd.f32 2.0, %v600_v8  ;;  %v313_v21 = vmin.f32 %v785_v14, 20.0  ;;  %v391_v23 = vmul.f32 %v375_v51, %v732_v49 }
  0xc5   :  { %447 = vst [vmem:[%s835_s3 + $0x28] sm:$0xff] %v431_v32  ;;  %609 = vpow2.f32 %v342_v31  ;;  %v380_v25 = vmul.f32 %v364_v57, %v735_v53  ;;  %v336_v29 = vmul.f32 1.442695, %v309_v18  ;;  %v384_v48 = vmul.f32 %v368_v0, %v738_v54 }
  0xc6   :  { %v372_v17 = vmul.f32 %v600_v8, %v356_v11  ;;  %611 = vpow2.f32 %v320_v9  ;;  %v344_v34 = vmul.f32 1.442695, %v313_v21 }
  0xc7   :  { %v602_v22 = vpop.eup %601  ;;  %613 = vpow2.f32 %v328_v10 }
  0xc8   :  { %v604_v24 = vpop.eup %603  ;;  %v435_v16 = vmul.f32 %v602_v22, %v387_v15  ;;  %v404_v26 = vadd.f32 2.0, %v372_v17  ;;  %v388_v27 = vmul.f32 %v372_v17, %v745_v12 }
  0xc9   :  { %v606_v30 = vpop.eup %605  ;;  %v439_v33 = vmul.f32 %v604_v24, %v391_v23 }
  0xca   :  { %v608_v35 = vpop.eup %607  ;;  %451 = vst [vmem:[%s835_s3 + $0x48] sm:$0xff] %v435_v16  ;;  %v428_v19 = vmul.f32 %v606_v30, %v380_v25  ;;  %615 = vrcp.f32 %v404_v26 }
  0xcb   :  { %v610_v49 = vpop.eup %609  ;;  %455 = vst [vmem:[%s835_s3 + $0x68] sm:$0xff] %v439_v33  ;;  %v432_v53 = vmul.f32 %v608_v35, %v384_v48  ;;  %617 = vpow2.f32 %v336_v29 }
  0xcc   :  { %v612_v36 = vpop.eup %611  ;;  %444 = vst [vmem:[%s835_s3 + $0x10] sm:$0xff] %v428_v19  ;;  %v360_v54 = vadd.f32 2.0, %v610_v49  ;;  %619 = vpow2.f32 %v344_v34 }
  0xcd   :  { %v614_v37 = vpop.eup %613  ;;  %448 = vst [vmem:[%s835_s3 + $0x30] sm:$0xff] %v432_v53  ;;  %v349_v20 = vadd.f32 2.0, %v612_v36 }
  0xce   :  { %v376_v38 = vmul.f32 %v610_v49, %v360_v54  ;;  %v353_v40 = vadd.f32 2.0, %v614_v37 }
  0xcf   :  { %v365_v43 = vmul.f32 %v612_v36, %v349_v20 }
  0xd0   :  { %v616_v44 = vpop.eup %615  ;;  %v408_v45 = vadd.f32 2.0, %v376_v38  ;;  %v369_v46 = vmul.f32 %v614_v37, %v353_v40  ;;  %v392_v60 = vmul.f32 %v376_v38, %v755_v39 }
  0xd1   :  { %v618_v47 = vpop.eup %617  ;;  %v436_v50 = vmul.f32 %v616_v44, %v388_v27  ;;  %v397_v51 = vadd.f32 2.0, %v365_v43  ;;  %v381_v63 = vmul.f32 %v365_v43, %v761_v41 }
  0xd2   :  { %v620_v52 = vpop.eup %619  ;;  %621 = vrcp.f32 %v408_v45  ;;  %v401_v55 = vadd.f32 2.0, %v369_v46  ;;  %v357_v56 = vadd.f32 2.0, %v618_v47  ;;  %v385_v2 = vmul.f32 %v369_v46, %v764_v42 }
  0xd3   :  { %452 = vst [vmem:[%s835_s3 + $0x50] sm:$0xff] %v436_v50  ;;  %623 = vrcp.f32 %v397_v51  ;;  %v361_v57 = vadd.f32 2.0, %v620_v52 }
  0xd4   :  { %625 = vrcp.f32 %v401_v55  ;;  %v373_v58 = vmul.f32 %v618_v47, %v357_v56 }
  0xd5   :  { %v377_v12 = vmul.f32 %v620_v52, %v361_v57 }
  0xd6   :  { %v405_v59 = vadd.f32 2.0, %v373_v58  ;;  %v389_v39 = vmul.f32 %v373_v58, %v782_v13 }
  0xd7   :  { %v409_v61 = vadd.f32 2.0, %v377_v12  ;;  %v393_v42 = vmul.f32 %v377_v12, %v785_v14 }
  0xd8   :  { %v622_v62 = vpop.eup %621  ;;  %627 = vrcp.f32 %v405_v59 }
  0xd9   :  { %v624_v0 = vpop.eup %623  ;;  %v440_v1 = vmul.f32 %v622_v62, %v392_v60  ;;  %629 = vrcp.f32 %v409_v61 }
  0xda   :  { %v626_v28 = vpop.eup %625  ;;  %v429_v31 = vmul.f32 %v624_v0, %v381_v63 }
  0xdb   :  { %456 = vst [vmem:[%s835_s3 + $0x70] sm:$0xff] %v440_v1  ;;  %v433_v3 = vmul.f32 %v626_v28, %v385_v2 }
  0xdc   :  { %445 = vst [vmem:[%s835_s3 + $0x18] sm:$0xff] %v429_v31 }
  0xdd   :  { %449 = vst [vmem:[%s835_s3 + $0x38] sm:$0xff] %v433_v3 }
  0xde   :  { %v628_v41 = vpop.eup %627 }
  0xdf   :  { %v630_v4 = vpop.eup %629  ;;  %v437_v5 = vmul.f32 %v628_v41, %v389_v39 }
  0xe0   :  { %v441_v6 = vmul.f32 %v630_v4, %v393_v42 }
  0xe1   :  { %453 = vst [vmem:[%s835_s3 + $0x58] sm:$0xff] %v437_v5 }
  0xe2   :  { %457 = vst [vmem:[%s835_s3 + $0x78] sm:$0xff] %v441_v6 }

// kernel: csp_first_stage.11
= control target key start
LH: loop header
LB: loop body
LE: loop exit
PB: predicated region body
PF: predicated region fallthrough
CT: control target
= control target key end

     0   :  { %s920_s1 = inlined_call_operand.vmem [shape: bf16[128,128], index: 1, kind: input, shape index: {}]   ;;  %s921_s2 = inlined_call_operand.vmem [shape: f32[1,128], index: 2, kind: input, shape index: {}]   ;;  %s922_s0 = inlined_call_operand.vmem [shape: bf16[128,128], index: 0, kind: input, shape index: {}]   ;;  %s923_s3 = inlined_call_operand.vmem [shape: f32[128,128], index: 3, kind: input, shape index: {}]   ;;  %s924_s4 = inlined_call_operand.vmem [shape: f32[128,128], index: 4, kind: output, shape index: {}]  }
   0x1   :  { %v576_v0 = vld [vmem:[%s920_s1 + $0x38] sm:$0xff]  ;;  %v575_v1 = vld [vmem:[%s920_s1 + $0x30] sm:$0xff]  ;;  %v574_v2 = vld [vmem:[%s920_s1 + $0x28] sm:$0xff] }
   0x2   :  { %181 = vmatpush.bf16.msra.mxu0 %v576_v0  ;;  %577 = vmatpush.bf16.msra.mxu1 %v576_v0  ;;  %v573_v3 = vld [vmem:[%s920_s1 + $0x20] sm:$0xff]  ;;  %v572_v4 = vld [vmem:[%s920_s1 + $0x18] sm:$0xff]  ;;  %v571_v5 = vld [vmem:[%s920_s1 + $0x10] sm:$0xff] }
   0x3   :  { %578 = vmatpush.bf16.msra.mxu2 %v576_v0  ;;  %579 = vmatpush.bf16.msra.mxu3 %v576_v0  ;;  %v570_v6 = vld [vmem:[%s920_s1 + $0x8] sm:$0xff]  ;;  %v569_v7 = vld [vmem:[%s920_s1] sm:$0xff]  ;;  %v563_v9 = vld [vmem:[%s922_s0 + $0x10] sm:$0xff] }
   0x4   :  { %v561_v8 = vld [vmem:[%s922_s0] sm:$0xff]  ;;  %v567_v11 = vld [vmem:[%s922_s0 + $0x30] sm:$0xff]  ;;  %v562_v12 = vld [vmem:[%s922_s0 + $0x8] sm:$0xff] }
   0x5   :  { %v565_v10 = vld [vmem:[%s922_s0 + $0x20] sm:$0xff]  ;;  %v564_v13 = vld [vmem:[%s922_s0 + $0x18] sm:$0xff]  ;;  %v566_v14 = vld [vmem:[%s922_s0 + $0x28] sm:$0xff] }
   0x6   :  { %182 = vmatpush.bf16.msra.mxu0 %v575_v1  ;;  %580 = vmatpush.bf16.msra.mxu1 %v575_v1  ;;  %v568_v15 = vld [vmem:[%s922_s0 + $0x38] sm:$0xff]  ;;  %v742_v16 = vld [vmem:[%s921_s2] ss:$0 sm:$0xff] }
   0x7   :  { %581 = vmatpush.bf16.msra.mxu2 %v575_v1  ;;  %582 = vmatpush.bf16.msra.mxu3 %v575_v1 }
   0xa   :  { %183 = vmatpush.bf16.msra.mxu0 %v574_v2  ;;  %583 = vmatpush.bf16.msra.mxu1 %v574_v2 }
   0xb   :  { %584 = vmatpush.bf16.msra.mxu2 %v574_v2  ;;  %585 = vmatpush.bf16.msra.mxu3 %v574_v2 }
   0xe   :  { %184 = vmatpush.bf16.msra.mxu0 %v573_v3  ;;  %586 = vmatpush.bf16.msra.mxu1 %v573_v3 }
   0xf   :  { %587 = vmatpush.bf16.msra.mxu2 %v573_v3  ;;  %588 = vmatpush.bf16.msra.mxu3 %v573_v3 }
  0x12   :  { %185 = vmatpush.bf16.msra.mxu0 %v572_v4  ;;  %589 = vmatpush.bf16.msra.mxu1 %v572_v4 }
  0x13   :  { %590 = vmatpush.bf16.msra.mxu2 %v572_v4  ;;  %591 = vmatpush.bf16.msra.mxu3 %v572_v4 }
  0x16   :  { %186 = vmatpush.bf16.msra.mxu0 %v571_v5  ;;  %592 = vmatpush.bf16.msra.mxu1 %v571_v5 }
  0x17   :  { %593 = vmatpush.bf16.msra.mxu2 %v571_v5  ;;  %594 = vmatpush.bf16.msra.mxu3 %v571_v5 }
  0x1a   :  { %187 = vmatpush.bf16.msra.mxu0 %v570_v6  ;;  %595 = vmatpush.bf16.msra.mxu1 %v570_v6 }
  0x1b   :  { %596 = vmatpush.bf16.msra.mxu2 %v570_v6  ;;  %597 = vmatpush.bf16.msra.mxu3 %v570_v6 }
  0x1e   :  { %188 = vmatpush.bf16.msra.mxu0 %v569_v7  ;;  %598 = vmatpush.bf16.msra.mxu1 %v569_v7 }
  0x1f   :  { %599 = vmatpush.bf16.msra.mxu2 %v569_v7  ;;  %600 = vmatpush.bf16.msra.mxu3 %v569_v7 }
  0x21   :  { %189 = vmatmul.bf16.vlgmr.msra.gmra.mxu0 %v561_v8  ;;  %199 = vmatmul.bf16.vlgmr.msra.gmra.mxu1 %v563_v9 }
  0x22   :  { %209 = vmatmul.bf16.vlgmr.msra.gmra.mxu2 %v565_v10  ;;  %219 = vmatmul.bf16.vlgmr.msra.gmra.mxu3 %v567_v11 }
  0x31   :  { %194 = vmatmul.bf16.gmra.mxu0 %v562_v12  ;;  %204 = vmatmul.bf16.gmra.mxu1 %v564_v13 }
  0x32   :  { %214 = vmatmul.bf16.gmra.mxu2 %v566_v14  ;;  %224 = vmatmul.bf16.gmra.mxu3 %v568_v15 }
  0x9e   :  { %v190_v17 = vpop.f32.mrf.mxu0  ;;  %v200_v18 = vpop.f32.mrf.mxu1 }
  0x9f   :  { %v745_v19 = vadd.f32 %v742_v16, %v190_v17  ;;  %v748_v20 = vadd.f32 %v742_v16, %v200_v18  ;;  %v445_v18 = vld [vmem:[%s923_s3] sm:$0xff] }
  0xa1   :  { %v301_v21 = vmin.f32 %v745_v19, 20.0  ;;  %v305_v22 = vmin.f32 %v748_v20, 20.0 }
  0xa3   :  { %v317_v23 = vmul.f32 1.442695, %v301_v21  ;;  %v325_v24 = vmul.f32 1.442695, %v305_v22 }
  0xa5   :  { %602 = vpow2.f32 %v317_v23  ;;  %v210_v25 = vpop.f32.mrf.mxu2  ;;  %v220_v26 = vpop.f32.mrf.mxu3 }
  0xa6   :  { %604 = vpow2.f32 %v325_v24  ;;  %v753_v27 = vadd.f32 %v742_v16, %v210_v25  ;;  %v756_v28 = vadd.f32 %v742_v16, %v220_v26  ;;  %v192_v29 = vpop.f32.mrf.mxu0  ;;  %v202_v30 = vpop.f32.mrf.mxu1 }
  0xa7   :  { %v759_v31 = vadd.f32 %v742_v16, %v192_v29  ;;  %v762_v32 = vadd.f32 %v742_v16, %v202_v30 }
  0xa8   :  { %v309_v33 = vmin.f32 %v753_v27, 20.0  ;;  %v313_v34 = vmin.f32 %v756_v28, 20.0 }
  0xa9   :  { %v302_v35 = vmin.f32 %v759_v31, 20.0  ;;  %v306_v36 = vmin.f32 %v762_v32, 20.0 }
  0xaa   :  { %v333_v37 = vmul.f32 1.442695, %v309_v33  ;;  %v341_v38 = vmul.f32 1.442695, %v313_v34 }
  0xab   :  { %v603_v39 = vpop.eup %602  ;;  %v319_v40 = vmul.f32 1.442695, %v302_v35  ;;  %v327_v41 = vmul.f32 1.442695, %v306_v36 }
  0xac   :  { %v605_v42 = vpop.eup %604  ;;  %v349_v43 = vadd.f32 2.0, %v603_v39  ;;  %606 = vpow2.f32 %v333_v37 }
  0xad   :  { %v353_v44 = vadd.f32 2.0, %v605_v42  ;;  %608 = vpow2.f32 %v341_v38  ;;  %v212_v45 = vpop.f32.mrf.mxu2  ;;  %v222_v46 = vpop.f32.mrf.mxu3 }
  0xae   :  { %v365_v47 = vmul.f32 %v603_v39, %v349_v43  ;;  %610 = vpow2.f32 %v319_v40  ;;  %v769_v48 = vadd.f32 %v742_v16, %v212_v45  ;;  %v772_v49 = vadd.f32 %v742_v16, %v222_v46  ;;  %v195_v50 = vpop.f32.mrf.mxu0  ;;  %v205_v51 = vpop.f32.mrf.mxu1 }
  0xaf   :  { %v369_v52 = vmul.f32 %v605_v42, %v353_v44  ;;  %612 = vpow2.f32 %v327_v41  ;;  %v775_v53 = vadd.f32 %v742_v16, %v195_v50  ;;  %v778_v54 = vadd.f32 %v742_v16, %v205_v51 }
  0xb0   :  { %v397_v55 = vadd.f32 2.0, %v365_v47  ;;  %v310_v56 = vmin.f32 %v769_v48, 20.0  ;;  %v314_v57 = vmin.f32 %v772_v49, 20.0  ;;  %v381_v13 = vmul.f32 %v365_v47, %v745_v19  ;;  %v449_v19 = vld [vmem:[%s923_s3 + $0x20] sm:$0xff] }
  0xb1   :  { %v401_v58 = vadd.f32 2.0, %v369_v52  ;;  %v303_v59 = vmin.f32 %v775_v53, 20.0  ;;  %v307_v60 = vmin.f32 %v778_v54, 20.0  ;;  %v385_v21 = vmul.f32 %v369_v52, %v748_v20 }
  0xb2   :  { %v607_v61 = vpop.eup %606  ;;  %614 = vrcp.f32 %v397_v55  ;;  %v335_v62 = vmul.f32 1.442695, %v310_v56  ;;  %v343_v63 = vmul.f32 1.442695, %v314_v57 }
  0xb3   :  { %v609_v0 = vpop.eup %608  ;;  %616 = vrcp.f32 %v401_v58  ;;  %v357_v1 = vadd.f32 2.0, %v607_v61  ;;  %v321_v2 = vmul.f32 1.442695, %v303_v59  ;;  %v329_v3 = vmul.f32 1.442695, %v307_v60  ;;  %v453_v58 = vld [vmem:[%s923_s3 + $0x40] sm:$0xff] }
  0xb4   :  { %v611_v4 = vpop.eup %610  ;;  %v361_v5 = vadd.f32 2.0, %v609_v0  ;;  %618 = vpow2.f32 %v335_v62 }
  0xb5   :  { %v613_v6 = vpop.eup %612  ;;  %v373_v7 = vmul.f32 %v607_v61, %v357_v1  ;;  %v350_v8 = vadd.f32 2.0, %v611_v4  ;;  %620 = vpow2.f32 %v343_v63  ;;  %v215_v9 = vpop.f32.mrf.mxu2 }
  0xb6   :  { %v377_v10 = vmul.f32 %v609_v0, %v361_v5  ;;  %v354_v11 = vadd.f32 2.0, %v613_v6  ;;  %622 = vpow2.f32 %v321_v2  ;;  %v785_v12 = vadd.f32 %v742_v16, %v215_v9  ;;  %v225_v30 = vpop.f32.mrf.mxu3  ;;  %v197_v20 = vpop.f32.mrf.mxu0 }
  0xb7   :  { %v405_v14 = vadd.f32 2.0, %v373_v7  ;;  %v366_v15 = vmul.f32 %v611_v4, %v350_v8  ;;  %624 = vpow2.f32 %v329_v3  ;;  %v389_v35 = vmul.f32 %v373_v7, %v753_v27  ;;  %v207_v56 = vpop.f32.mrf.mxu1 }
  0xb8   :  { %v615_v17 = vpop.eup %614  ;;  %v409_v22 = vadd.f32 2.0, %v377_v10  ;;  %v370_v23 = vmul.f32 %v613_v6, %v354_v11  ;;  %v311_v24 = vmin.f32 %v785_v12, 20.0  ;;  %v798_v44 = vadd.f32 %v742_v16, %v225_v30 }
  0xb9   :  { %v617_v25 = vpop.eup %616  ;;  %v429_v26 = vmul.f32 %v615_v17, %v381_v13  ;;  %626 = vrcp.f32 %v405_v14  ;;  %v398_v29 = vadd.f32 2.0, %v366_v15  ;;  %v804_v47 = vadd.f32 %v742_v16, %v197_v20 }
  0xba   :  { %v619_v33 = vpop.eup %618  ;;  %v433_v34 = vmul.f32 %v617_v25, %v385_v21  ;;  %628 = vrcp.f32 %v409_v22  ;;  %v402_v36 = vadd.f32 2.0, %v370_v23  ;;  %v337_v40 = vmul.f32 1.442695, %v311_v24 }
  0xbb   :  { %v621_v37 = vpop.eup %620  ;;  %v461_v38 = vadd.f32 %v445_v18, %v429_v26  ;;  %630 = vrcp.f32 %v398_v29  ;;  %v358_v39 = vadd.f32 2.0, %v619_v33  ;;  %v393_v50 = vmul.f32 %v377_v10, %v756_v28  ;;  %v457_v28 = vld [vmem:[%s923_s3 + $0x60] sm:$0xff]  ;;  %v450_v10 = vld [vmem:[%s923_s3 + $0x28] sm:$0xff] }
  0xbc   :  { %v623_v41 = vpop.eup %622  ;;  %v465_v42 = vadd.f32 %v449_v19, %v433_v34  ;;  %632 = vrcp.f32 %v402_v36  ;;  %v362_v43 = vadd.f32 2.0, %v621_v37  ;;  %v382_v51 = vmul.f32 %v366_v15, %v759_v31 }
  0xbd   :  { %v625_v45 = vpop.eup %624  ;;  %477 = vst [vmem:[%s924_s4] sm:$0xff] %v461_v38  ;;  %v374_v27 = vmul.f32 %v619_v33, %v358_v39  ;;  %v351_v46 = vadd.f32 2.0, %v623_v41  ;;  %634 = vpow2.f32 %v337_v40  ;;  %v386_v59 = vmul.f32 %v370_v23, %v762_v32  ;;  %v446_v32 = vld [vmem:[%s923_s3 + $0x8] sm:$0xff]  ;;  %v217_v11 = vpop.f32.mrf.mxu2 }
  0xbe   :  { %481 = vst [vmem:[%s924_s4 + $0x20] sm:$0xff] %v465_v42  ;;  %v378_v52 = vmul.f32 %v621_v37, %v362_v43  ;;  %v355_v55 = vadd.f32 2.0, %v625_v45  ;;  %v315_v62 = vmin.f32 %v798_v44, 20.0  ;;  %v304_v2 = vmin.f32 %v804_v47, 20.0  ;;  %v227_v18 = vpop.f32.mrf.mxu3 }
  0xbf   :  { %v627_v57 = vpop.eup %626  ;;  %v406_v60 = vadd.f32 2.0, %v374_v27  ;;  %v367_v61 = vmul.f32 %v623_v41, %v351_v46  ;;  %v824_v6 = vadd.f32 %v742_v16, %v207_v56  ;;  %v837_v19 = vadd.f32 %v742_v16, %v217_v11 }
  0xc0   :  { %v629_v63 = vpop.eup %628  ;;  %v437_v0 = vmul.f32 %v627_v57, %v389_v35  ;;  %v410_v31 = vadd.f32 2.0, %v378_v52  ;;  %v371_v1 = vmul.f32 %v625_v45, %v355_v55  ;;  %v345_v23 = vmul.f32 1.442695, %v315_v62  ;;  %v454_v35 = vld [vmem:[%s923_s3 + $0x48] sm:$0xff] }
  0xc1   :  { %v631_v3 = vpop.eup %630  ;;  %v441_v4 = vmul.f32 %v629_v63, %v393_v50  ;;  %636 = vrcp.f32 %v406_v60  ;;  %v399_v5 = vadd.f32 2.0, %v367_v61  ;;  %v323_v24 = vmul.f32 1.442695, %v304_v2 }
  0xc2   :  { %v633_v7 = vpop.eup %632  ;;  %v469_v8 = vadd.f32 %v453_v58, %v437_v0  ;;  %v430_v9 = vmul.f32 %v631_v3, %v382_v51  ;;  %638 = vrcp.f32 %v410_v31  ;;  %v403_v17 = vadd.f32 2.0, %v371_v1  ;;  %v455_v31 = vld [vmem:[%s923_s3 + $0x50] sm:$0xff] }
  0xc3   :  { %v635_v13 = vpop.eup %634  ;;  %v473_v14 = vadd.f32 %v457_v28, %v441_v4  ;;  %v434_v15 = vmul.f32 %v633_v7, %v386_v59  ;;  %640 = vrcp.f32 %v399_v5  ;;  %v308_v26 = vmin.f32 %v824_v6, 20.0 }
  0xc4   :  { %485 = vst [vmem:[%s924_s4 + $0x40] sm:$0xff] %v469_v8  ;;  %v462_v21 = vadd.f32 %v446_v32, %v430_v9  ;;  %v359_v22 = vadd.f32 2.0, %v635_v13  ;;  %642 = vrcp.f32 %v403_v17  ;;  %v390_v29 = vmul.f32 %v374_v27, %v769_v48 }
  0xc5   :  { %489 = vst [vmem:[%s924_s4 + $0x60] sm:$0xff] %v473_v14  ;;  %v466_v25 = vadd.f32 %v450_v10, %v434_v15  ;;  %644 = vpow2.f32 %v345_v23  ;;  %v844_v33 = vadd.f32 %v742_v16, %v227_v18  ;;  %v394_v36 = vmul.f32 %v378_v52, %v772_v49  ;;  %v458_v16 = vld [vmem:[%s923_s3 + $0x68] sm:$0xff]  ;;  %v447_v49 = vld [vmem:[%s923_s3 + $0x10] sm:$0xff] }
  0xc6   :  { %478 = vst [vmem:[%s924_s4 + $0x8] sm:$0xff] %v462_v21  ;;  %v375_v30 = vmul.f32 %v635_v13, %v359_v22  ;;  %646 = vpow2.f32 %v323_v24  ;;  %v331_v20 = vmul.f32 1.442695, %v308_v26  ;;  %v312_v48 = vmin.f32 %v837_v19, 20.0  ;;  %v459_v22 = vld [vmem:[%s923_s3 + $0x70] sm:$0xff]  ;;  %v448_v26 = vld [vmem:[%s923_s3 + $0x18] sm:$0xff] }
  0xc7   :  { %v637_v34 = vpop.eup %636  ;;  %482 = vst [vmem:[%s924_s4 + $0x28] sm:$0xff] %v466_v25  ;;  %v383_v39 = vmul.f32 %v367_v61, %v775_v53  ;;  %v316_v41 = vmin.f32 %v844_v33, 20.0  ;;  %v387_v45 = vmul.f32 %v371_v1, %v778_v54  ;;  %v451_v53 = vld [vmem:[%s923_s3 + $0x30] sm:$0xff] }
  0xc8   :  { %v639_v37 = vpop.eup %638  ;;  %v438_v38 = vmul.f32 %v637_v34, %v390_v29  ;;  %v407_v40 = vadd.f32 2.0, %v375_v30  ;;  %648 = vpow2.f32 %v331_v20  ;;  %v339_v27 = vmul.f32 1.442695, %v312_v48 }
  0xc9   :  { %v641_v42 = vpop.eup %640  ;;  %v442_v43 = vmul.f32 %v639_v37, %v394_v36  ;;  %v347_v51 = vmul.f32 1.442695, %v316_v41  ;;  %v391_v63 = vmul.f32 %v375_v30, %v785_v12  ;;  %v456_v37 = vld [vmem:[%s923_s3 + $0x58] sm:$0xff] }
  0xca   :  { %v470_v46 = vadd.f32 %v454_v35, %v438_v38  ;;  %v431_v50 = vmul.f32 %v641_v42, %v383_v39  ;;  %650 = vrcp.f32 %v407_v40  ;;  %v643_v52 = vpop.eup %642  ;;  %v452_v35 = vld [vmem:[%s923_s3 + $0x38] sm:$0xff] }
  0xcb   :  { %v474_v55 = vadd.f32 %v458_v16, %v442_v43  ;;  %652 = vpow2.f32 %v339_v27  ;;  %v645_v56 = vpop.eup %644  ;;  %v435_v54 = vmul.f32 %v643_v52, %v387_v45 }
  0xcc   :  { %486 = vst [vmem:[%s924_s4 + $0x48] sm:$0xff] %v470_v46  ;;  %v463_v57 = vadd.f32 %v447_v49, %v431_v50  ;;  %654 = vpow2.f32 %v347_v51  ;;  %v647_v58 = vpop.eup %646  ;;  %v363_v59 = vadd.f32 2.0, %v645_v56 }
  0xcd   :  { %490 = vst [vmem:[%s924_s4 + $0x68] sm:$0xff] %v474_v55  ;;  %v467_v60 = vadd.f32 %v451_v53, %v435_v54  ;;  %v352_v61 = vadd.f32 2.0, %v647_v58 }
  0xce   :  { %479 = vst [vmem:[%s924_s4 + $0x10] sm:$0xff] %v463_v57  ;;  %v649_v62 = vpop.eup %648  ;;  %v379_v0 = vmul.f32 %v645_v56, %v363_v59 }
  0xcf   :  { %483 = vst [vmem:[%s924_s4 + $0x30] sm:$0xff] %v467_v60  ;;  %v368_v1 = vmul.f32 %v647_v58, %v352_v61  ;;  %v356_v2 = vadd.f32 2.0, %v649_v62 }
  0xd0   :  { %v651_v28 = vpop.eup %650  ;;  %v411_v32 = vadd.f32 2.0, %v379_v0  ;;  %v395_v18 = vmul.f32 %v379_v0, %v798_v44 }
  0xd1   :  { %v653_v3 = vpop.eup %652  ;;  %v439_v4 = vmul.f32 %v651_v28, %v391_v63  ;;  %v400_v7 = vadd.f32 2.0, %v368_v1  ;;  %v372_v8 = vmul.f32 %v649_v62, %v356_v2  ;;  %v384_v23 = vmul.f32 %v368_v1, %v804_v47 }
  0xd2   :  { %v655_v5 = vpop.eup %654  ;;  %v360_v9 = vadd.f32 2.0, %v653_v3  ;;  %656 = vrcp.f32 %v411_v32 }
  0xd3   :  { %v471_v12 = vadd.f32 %v455_v31, %v439_v4  ;;  %v364_v10 = vadd.f32 2.0, %v655_v5  ;;  %658 = vrcp.f32 %v400_v7  ;;  %v404_v11 = vadd.f32 2.0, %v372_v8 }
  0xd4   :  { %v376_v13 = vmul.f32 %v653_v3, %v360_v9  ;;  %v388_v30 = vmul.f32 %v372_v8, %v824_v6 }
  0xd5   :  { %487 = vst [vmem:[%s924_s4 + $0x50] sm:$0xff] %v471_v12  ;;  %v380_v14 = vmul.f32 %v655_v5, %v364_v10  ;;  %660 = vrcp.f32 %v404_v11 }
  0xd6   :  { %v408_v15 = vadd.f32 2.0, %v376_v13  ;;  %v392_v47 = vmul.f32 %v376_v13, %v837_v19  ;;  %v460_v19 = vld [vmem:[%s923_s3 + $0x78] sm:$0xff] }
  0xd7   :  { %v412_v17 = vadd.f32 2.0, %v380_v14  ;;  %v396_v6 = vmul.f32 %v380_v14, %v844_v33 }
  0xd8   :  { %662 = vrcp.f32 %v408_v15  ;;  %v657_v21 = vpop.eup %656 }
  0xd9   :  { %664 = vrcp.f32 %v412_v17  ;;  %v659_v24 = vpop.eup %658  ;;  %v443_v25 = vmul.f32 %v657_v21, %v395_v18 }
  0xda   :  { %v432_v29 = vmul.f32 %v659_v24, %v384_v23 }
  0xdb   :  { %v661_v34 = vpop.eup %660  ;;  %v475_v44 = vadd.f32 %v459_v22, %v443_v25 }
  0xdc   :  { %v464_v36 = vadd.f32 %v448_v26, %v432_v29  ;;  %v436_v20 = vmul.f32 %v661_v34, %v388_v30 }
  0xdd   :  { %491 = vst [vmem:[%s924_s4 + $0x70] sm:$0xff] %v475_v44 }
  0xde   :  { %v663_v48 = vpop.eup %662  ;;  %480 = vst [vmem:[%s924_s4 + $0x18] sm:$0xff] %v464_v36  ;;  %v468_v16 = vadd.f32 %v452_v35, %v436_v20 }
  0xdf   :  { %v665_v38 = vpop.eup %664  ;;  %v440_v39 = vmul.f32 %v663_v48, %v392_v47 }
  0xe0   :  { %v444_v40 = vmul.f32 %v665_v38, %v396_v6  ;;  %484 = vst [vmem:[%s924_s4 + $0x38] sm:$0xff] %v468_v16 }
  0xe1   :  { %v472_v41 = vadd.f32 %v456_v37, %v440_v39 }
  0xe2   :  { %v476_v42 = vadd.f32 %v460_v19, %v444_v40 }
  0xe3   :  { %488 = vst [vmem:[%s924_s4 + $0x58] sm:$0xff] %v472_v41 }
  0xe4   :  { %492 = vst [vmem:[%s924_s4 + $0x78] sm:$0xff] %v476_v42 }

</bundles_post_ra>
